<compile_context>
chip_gen: v7x
topology: tpu7x:2x2x1
jax: 0.10.0
libtpu: 0.0.40
codegen_flags: <defaults>
</compile_context>

<pallas_src>
import jax
import jax.numpy as jnp
from jax.experimental import pallas as pl
from jax.experimental.pallas import tpu as pltpu

hidden_dims = [12, 128, 128, 64, 256, 64, 256, 64, 32]
input_dim = 6
output_dim = 1

_DIMS = [input_dim] + hidden_dims + [output_dim]
_NUM_LAYERS = len(_DIMS) - 1


def _round_up(n, m):
    return ((n + m - 1) // m) * m


def _layer_meta():
    """Static packing metadata: (row_offset, pdin, pdout, din, dout) per layer."""
    meta, row = [], 0
    for li in range(_NUM_LAYERS):
        din, dout = _DIMS[li], _DIMS[li + 1]
        pdin = _round_up(din, 16)      # sublane pad (bf16 packs 2 rows/sublane)
        pdout = _round_up(dout, 128)   # lane pad
        meta.append((row, pdin, pdout, din, dout))
        row += pdin
    return meta, row


_LAYER_META, _W_ROWS = _layer_meta()          # _W_ROWS = 1024
_W_LANES = max(m[2] for m in _LAYER_META)     # 256
_B_ROWS = _round_up(_NUM_LAYERS, 8)           # 16
_IN_PAD = _round_up(_DIMS[0], 128)            # 128
_OUT_PAD = _round_up(_DIMS[-1], 128)          # 128


def mlp_kernel(x_ref, w_ref, b_ref, o_ref):
    """Fully fused forward: 10 x (matmul + bias [+ ReLU]) on one batch tile."""
    h = x_ref[...]                                            # (BB, 128) f32
    for li, (row, pdin, pdout, din, dout) in enumerate(_LAYER_META):
        w = w_ref[row:row + pdin, :pdout].astype(jnp.float32)  # bf16 -> f32
        b = b_ref[li:li + 1, :pdout]                           # (1, pdout) f32
        h = jnp.dot(h[:, :pdin], w, preferred_element_type=jnp.float32) + b
        if li < _NUM_LAYERS - 1:                               # last layer: no ReLU
            h = jnp.maximum(h, 0.0)
    o_ref[...] = h                                             # (BB, 128)


def make_mlp_params(key):
    """PyTorch-style default Linear init (uniform +-1/sqrt(fan_in)), deterministic."""
    ws, bs = [], []
    for i in range(_NUM_LAYERS):
        key, kw, kb = jax.random.split(key, 3)
        bound = 1.0 / (_DIMS[i] ** 0.5)
        ws.append(jax.random.uniform(kw, (_DIMS[i], _DIMS[i + 1]), jnp.float32,
                                     -bound, bound))
        bs.append(jax.random.uniform(kb, (_DIMS[i + 1],), jnp.float32,
                                     -bound, bound))
    return ws, bs


def pack_params(ws, bs):
    """Pack all layers into one bf16 weight slab + one f32 bias slab (done once)."""
    w_slab = jnp.zeros((_W_ROWS, _W_LANES), jnp.float32)
    b_slab = jnp.zeros((_B_ROWS, _W_LANES), jnp.float32)
    for li, (row, pdin, pdout, din, dout) in enumerate(_LAYER_META):
        w_slab = w_slab.at[row:row + din, :dout].set(ws[li].astype(jnp.float32))
        b_slab = b_slab.at[li, :dout].set(bs[li].astype(jnp.float32))
    return w_slab.astype(jnp.bfloat16), b_slab


def mlp_pallas(x, w_slab, b_slab, block_b=256):
    B, D = x.shape
    assert D == input_dim
    BB = min(block_b, _round_up(B, 8))          # batch tile
    B_pad = _round_up(B, BB)
    xp = jnp.zeros((B_pad, _IN_PAD), jnp.float32).at[:B, :D].set(
        x.astype(jnp.float32))

    out = pl.pallas_call(
        mlp_kernel,
        out_shape=jax.ShapeDtypeStruct((B_pad, _OUT_PAD), jnp.float32),
        grid_spec=pltpu.PrefetchScalarGridSpec(
            num_scalar_prefetch=0,
            grid=(B_pad // BB,),
            in_specs=[
                pl.BlockSpec((BB, _IN_PAD), lambda i: (i, 0)),          # activations: pipelined
                pl.BlockSpec((_W_ROWS, _W_LANES), lambda i: (0, 0)),    # weights: VMEM-resident
                pl.BlockSpec((_B_ROWS, _W_LANES), lambda i: (0, 0)),    # biases: VMEM-resident
            ],
            out_specs=pl.BlockSpec((BB, _OUT_PAD), lambda i: (i, 0)),
        ),
        compiler_params=pltpu.CompilerParams(
            dimension_semantics=("parallel",),
            vmem_limit_bytes=32 * 1024 * 1024,
        ),
    )(xp, w_slab, b_slab)

    return out[:B, :output_dim]


def mlp_reference(x, w_slab, b_slab):
    """Pure-JAX reference using the same packed (bf16-rounded) parameters."""
    h = x.astype(jnp.float32)
    for li, (row, pdin, pdout, din, dout) in enumerate(_LAYER_META):
        w = w_slab[row:row + din, :dout].astype(jnp.float32)
        b = b_slab[li, :dout]
        h = h @ w + b
        if li < _NUM_LAYERS - 1:
            h = jnp.maximum(h, 0.0)
    return h


if __name__ == "__main__":
    key = jax.random.PRNGKey(0)
    kp, kx = jax.random.split(key)
    ws, bs = make_mlp_params(kp)
    w_slab, b_slab = pack_params(ws, bs)        # packed ONCE, outside the call

    batch = 8
    x = jax.random.normal(kx, (batch, input_dim), jnp.float32)

    y = mlp_pallas(x, w_slab, b_slab)
    y = jax.block_until_ready(y)

    y_ref = mlp_reference(x, w_slab, b_slab)
    assert y.shape == (batch, output_dim)
    assert jnp.allclose(y, y_ref, atol=1e-4, rtol=1e-4), "mismatch vs reference"

    print("KERNEL_OK")
</pallas_src>

<mosaic_0001>
module attributes {stable_mosaic.version = 11 : i64} {
  func.func @mlp_kernel(%arg0: i32, %arg1: memref<8x128xf32, #tpu.memory_space<vmem>>, %arg2: memref<1024x256xbf16, #tpu.memory_space<vmem>>, %arg3: memref<16x256xf32, #tpu.memory_space<vmem>>, %arg4: memref<8x128xf32, #tpu.memory_space<vmem>>) attributes {dimension_semantics = [#tpu.dimension_semantics<parallel>], iteration_bounds = array<i64: 1>, scalar_prefetch = 0 : i64, scratch_operands = 0 : i64, tpu.core_type = #tpu.core_type<tc>, window_params = [{transform_indices = @transform_0, window_bounds = array<i64: 8, 128>}, {pipeline_mode = #tpu.pipeline_mode<synchronous>, transform_indices = @transform_1, window_bounds = array<i64: 1024, 256>}, {pipeline_mode = #tpu.pipeline_mode<synchronous>, transform_indices = @transform_2, window_bounds = array<i64: 16, 256>}, {transform_indices = @transform_3, window_bounds = array<i64: 8, 128>}]} {
    %c0 = arith.constant 0 : index
    %c0_0 = arith.constant 0 : index
    %0 = vector.load %arg1[%c0, %c0_0] : memref<8x128xf32, #tpu.memory_space<vmem>>, vector<8x128xf32>
    %c0_1 = arith.constant 0 : index
    %c0_2 = arith.constant 0 : index
    %1 = vector.load %arg2[%c0_1, %c0_2] : memref<1024x256xbf16, #tpu.memory_space<vmem>>, vector<16x128xbf16>
    %2 = arith.extf %1 : vector<16x128xbf16> to vector<16x128xf32>
    %c0_3 = arith.constant 0 : index
    %c0_4 = arith.constant 0 : index
    %3 = vector.load %arg3[%c0_3, %c0_4] : memref<16x256xf32, #tpu.memory_space<vmem>>, vector<1x128xf32>
    %4 = vector.extract_strided_slice %0 {offsets = [0, 0], sizes = [8, 16], strides = [1, 1]} : vector<8x128xf32> to vector<8x16xf32>
    %cst = arith.constant dense<0.000000e+00> : vector<8x128xf32>
    %5 = tpu.matmul %4, %2, %cst {dimension_numbers = #tpu.dot_dimension_numbers<[1], [0], [0], [1], [0, 0, 1, 1], [], []>} : vector<8x16xf32>, vector<16x128xf32>, vector<8x128xf32> -> vector<8x128xf32>
    %6 = vector.broadcast %3 : vector<1x128xf32> to vector<8x128xf32>
    %7 = arith.addf %5, %6 : vector<8x128xf32>
    %cst_5 = arith.constant 0.000000e+00 : f32
    %8 = vector.broadcast %cst_5 : f32 to vector<8x128xf32>
    %9 = arith.maximumf %7, %8 : vector<8x128xf32>
    %c16 = arith.constant 16 : index
    %c0_6 = arith.constant 0 : index
    %10 = vector.load %arg2[%c16, %c0_6] : memref<1024x256xbf16, #tpu.memory_space<vmem>>, vector<16x128xbf16>
    %11 = arith.extf %10 : vector<16x128xbf16> to vector<16x128xf32>
    %c1 = arith.constant 1 : index
    %c0_7 = arith.constant 0 : index
    %12 = vector.load %arg3[%c1, %c0_7] : memref<16x256xf32, #tpu.memory_space<vmem>>, vector<1x128xf32>
    %13 = vector.extract_strided_slice %9 {offsets = [0, 0], sizes = [8, 16], strides = [1, 1]} : vector<8x128xf32> to vector<8x16xf32>
    %cst_8 = arith.constant dense<0.000000e+00> : vector<8x128xf32>
    %14 = tpu.matmul %13, %11, %cst_8 {dimension_numbers = #tpu.dot_dimension_numbers<[1], [0], [0], [1], [0, 0, 1, 1], [], []>} : vector<8x16xf32>, vector<16x128xf32>, vector<8x128xf32> -> vector<8x128xf32>
    %15 = vector.broadcast %12 : vector<1x128xf32> to vector<8x128xf32>
    %16 = arith.addf %14, %15 : vector<8x128xf32>
    %cst_9 = arith.constant 0.000000e+00 : f32
    %17 = vector.broadcast %cst_9 : f32 to vector<8x128xf32>
    %18 = arith.maximumf %16, %17 : vector<8x128xf32>
    %c32 = arith.constant 32 : index
    %c0_10 = arith.constant 0 : index
    %19 = vector.load %arg2[%c32, %c0_10] : memref<1024x256xbf16, #tpu.memory_space<vmem>>, vector<128x128xbf16>
    %20 = arith.extf %19 : vector<128x128xbf16> to vector<128x128xf32>
    %c2 = arith.constant 2 : index
    %c0_11 = arith.constant 0 : index
    %21 = vector.load %arg3[%c2, %c0_11] : memref<16x256xf32, #tpu.memory_space<vmem>>, vector<1x128xf32>
    %cst_12 = arith.constant dense<0.000000e+00> : vector<8x128xf32>
    %22 = tpu.matmul %18, %20, %cst_12 {dimension_numbers = #tpu.dot_dimension_numbers<[1], [0], [0], [1], [0, 0, 1, 1], [], []>} : vector<8x128xf32>, vector<128x128xf32>, vector<8x128xf32> -> vector<8x128xf32>
    %23 = vector.broadcast %21 : vector<1x128xf32> to vector<8x128xf32>
    %24 = arith.addf %22, %23 : vector<8x128xf32>
    %cst_13 = arith.constant 0.000000e+00 : f32
    %25 = vector.broadcast %cst_13 : f32 to vector<8x128xf32>
    %26 = arith.maximumf %24, %25 : vector<8x128xf32>
    %c160 = arith.constant 160 : index
    %c0_14 = arith.constant 0 : index
    %27 = vector.load %arg2[%c160, %c0_14] : memref<1024x256xbf16, #tpu.memory_space<vmem>>, vector<128x128xbf16>
    %28 = arith.extf %27 : vector<128x128xbf16> to vector<128x128xf32>
    %c3 = arith.constant 3 : index
    %c0_15 = arith.constant 0 : index
    %29 = vector.load %arg3[%c3, %c0_15] : memref<16x256xf32, #tpu.memory_space<vmem>>, vector<1x128xf32>
    %cst_16 = arith.constant dense<0.000000e+00> : vector<8x128xf32>
    %30 = tpu.matmul %26, %28, %cst_16 {dimension_numbers = #tpu.dot_dimension_numbers<[1], [0], [0], [1], [0, 0, 1, 1], [], []>} : vector<8x128xf32>, vector<128x128xf32>, vector<8x128xf32> -> vector<8x128xf32>
    %31 = vector.broadcast %29 : vector<1x128xf32> to vector<8x128xf32>
    %32 = arith.addf %30, %31 : vector<8x128xf32>
    %cst_17 = arith.constant 0.000000e+00 : f32
    %33 = vector.broadcast %cst_17 : f32 to vector<8x128xf32>
    %34 = arith.maximumf %32, %33 : vector<8x128xf32>
    %c288 = arith.constant 288 : index
    %c0_18 = arith.constant 0 : index
    %35 = vector.load %arg2[%c288, %c0_18] : memref<1024x256xbf16, #tpu.memory_space<vmem>>, vector<64x256xbf16>
    %36 = arith.extf %35 : vector<64x256xbf16> to vector<64x256xf32>
    %c4 = arith.constant 4 : index
    %c0_19 = arith.constant 0 : index
    %37 = vector.load %arg3[%c4, %c0_19] : memref<16x256xf32, #tpu.memory_space<vmem>>, vector<1x256xf32>
    %38 = vector.extract_strided_slice %34 {offsets = [0, 0], sizes = [8, 64], strides = [1, 1]} : vector<8x128xf32> to vector<8x64xf32>
    %cst_20 = arith.constant dense<0.000000e+00> : vector<8x256xf32>
    %39 = tpu.matmul %38, %36, %cst_20 {dimension_numbers = #tpu.dot_dimension_numbers<[1], [0], [0], [1], [0, 0, 1, 1], [], []>} : vector<8x64xf32>, vector<64x256xf32>, vector<8x256xf32> -> vector<8x256xf32>
    %40 = vector.broadcast %37 : vector<1x256xf32> to vector<8x256xf32>
    %41 = arith.addf %39, %40 : vector<8x256xf32>
    %cst_21 = arith.constant 0.000000e+00 : f32
    %42 = vector.broadcast %cst_21 : f32 to vector<8x256xf32>
    %43 = arith.maximumf %41, %42 : vector<8x256xf32>
    %c352 = arith.constant 352 : index
    %c0_22 = arith.constant 0 : index
    %44 = vector.load %arg2[%c352, %c0_22] : memref<1024x256xbf16, #tpu.memory_space<vmem>>, vector<256x128xbf16>
    %45 = arith.extf %44 : vector<256x128xbf16> to vector<256x128xf32>
    %c5 = arith.constant 5 : index
    %c0_23 = arith.constant 0 : index
    %46 = vector.load %arg3[%c5, %c0_23] : memref<16x256xf32, #tpu.memory_space<vmem>>, vector<1x128xf32>
    %cst_24 = arith.constant dense<0.000000e+00> : vector<8x128xf32>
    %47 = tpu.matmul %43, %45, %cst_24 {dimension_numbers = #tpu.dot_dimension_numbers<[1], [0], [0], [1], [0, 0, 1, 1], [], []>} : vector<8x256xf32>, vector<256x128xf32>, vector<8x128xf32> -> vector<8x128xf32>
    %48 = vector.broadcast %46 : vector<1x128xf32> to vector<8x128xf32>
    %49 = arith.addf %47, %48 : vector<8x128xf32>
    %cst_25 = arith.constant 0.000000e+00 : f32
    %50 = vector.broadcast %cst_25 : f32 to vector<8x128xf32>
    %51 = arith.maximumf %49, %50 : vector<8x128xf32>
    %c608 = arith.constant 608 : index
    %c0_26 = arith.constant 0 : index
    %52 = vector.load %arg2[%c608, %c0_26] : memref<1024x256xbf16, #tpu.memory_space<vmem>>, vector<64x256xbf16>
    %53 = arith.extf %52 : vector<64x256xbf16> to vector<64x256xf32>
    %c6 = arith.constant 6 : index
    %c0_27 = arith.constant 0 : index
    %54 = vector.load %arg3[%c6, %c0_27] : memref<16x256xf32, #tpu.memory_space<vmem>>, vector<1x256xf32>
    %55 = vector.extract_strided_slice %51 {offsets = [0, 0], sizes = [8, 64], strides = [1, 1]} : vector<8x128xf32> to vector<8x64xf32>
    %cst_28 = arith.constant dense<0.000000e+00> : vector<8x256xf32>
    %56 = tpu.matmul %55, %53, %cst_28 {dimension_numbers = #tpu.dot_dimension_numbers<[1], [0], [0], [1], [0, 0, 1, 1], [], []>} : vector<8x64xf32>, vector<64x256xf32>, vector<8x256xf32> -> vector<8x256xf32>
    %57 = vector.broadcast %54 : vector<1x256xf32> to vector<8x256xf32>
    %58 = arith.addf %56, %57 : vector<8x256xf32>
    %cst_29 = arith.constant 0.000000e+00 : f32
    %59 = vector.broadcast %cst_29 : f32 to vector<8x256xf32>
    %60 = arith.maximumf %58, %59 : vector<8x256xf32>
    %c672 = arith.constant 672 : index
    %c0_30 = arith.constant 0 : index
    %61 = vector.load %arg2[%c672, %c0_30] : memref<1024x256xbf16, #tpu.memory_space<vmem>>, vector<256x128xbf16>
    %62 = arith.extf %61 : vector<256x128xbf16> to vector<256x128xf32>
    %c7 = arith.constant 7 : index
    %c0_31 = arith.constant 0 : index
    %63 = vector.load %arg3[%c7, %c0_31] : memref<16x256xf32, #tpu.memory_space<vmem>>, vector<1x128xf32>
    %cst_32 = arith.constant dense<0.000000e+00> : vector<8x128xf32>
    %64 = tpu.matmul %60, %62, %cst_32 {dimension_numbers = #tpu.dot_dimension_numbers<[1], [0], [0], [1], [0, 0, 1, 1], [], []>} : vector<8x256xf32>, vector<256x128xf32>, vector<8x128xf32> -> vector<8x128xf32>
    %65 = vector.broadcast %63 : vector<1x128xf32> to vector<8x128xf32>
    %66 = arith.addf %64, %65 : vector<8x128xf32>
    %cst_33 = arith.constant 0.000000e+00 : f32
    %67 = vector.broadcast %cst_33 : f32 to vector<8x128xf32>
    %68 = arith.maximumf %66, %67 : vector<8x128xf32>
    %c928 = arith.constant 928 : index
    %c0_34 = arith.constant 0 : index
    %69 = vector.load %arg2[%c928, %c0_34] : memref<1024x256xbf16, #tpu.memory_space<vmem>>, vector<64x128xbf16>
    %70 = arith.extf %69 : vector<64x128xbf16> to vector<64x128xf32>
    %c8 = arith.constant 8 : index
    %c0_35 = arith.constant 0 : index
    %71 = vector.load %arg3[%c8, %c0_35] : memref<16x256xf32, #tpu.memory_space<vmem>>, vector<1x128xf32>
    %72 = vector.extract_strided_slice %68 {offsets = [0, 0], sizes = [8, 64], strides = [1, 1]} : vector<8x128xf32> to vector<8x64xf32>
    %cst_36 = arith.constant dense<0.000000e+00> : vector<8x128xf32>
    %73 = tpu.matmul %72, %70, %cst_36 {dimension_numbers = #tpu.dot_dimension_numbers<[1], [0], [0], [1], [0, 0, 1, 1], [], []>} : vector<8x64xf32>, vector<64x128xf32>, vector<8x128xf32> -> vector<8x128xf32>
    %74 = vector.broadcast %71 : vector<1x128xf32> to vector<8x128xf32>
    %75 = arith.addf %73, %74 : vector<8x128xf32>
    %cst_37 = arith.constant 0.000000e+00 : f32
    %76 = vector.broadcast %cst_37 : f32 to vector<8x128xf32>
    %77 = arith.maximumf %75, %76 : vector<8x128xf32>
    %c992 = arith.constant 992 : index
    %c0_38 = arith.constant 0 : index
    %78 = vector.load %arg2[%c992, %c0_38] : memref<1024x256xbf16, #tpu.memory_space<vmem>>, vector<32x128xbf16>
    %79 = arith.extf %78 : vector<32x128xbf16> to vector<32x128xf32>
    %c9 = arith.constant 9 : index
    %c0_39 = arith.constant 0 : index
    %80 = vector.load %arg3[%c9, %c0_39] : memref<16x256xf32, #tpu.memory_space<vmem>>, vector<1x128xf32>
    %81 = vector.extract_strided_slice %77 {offsets = [0, 0], sizes = [8, 32], strides = [1, 1]} : vector<8x128xf32> to vector<8x32xf32>
    %cst_40 = arith.constant dense<0.000000e+00> : vector<8x128xf32>
    %82 = tpu.matmul %81, %79, %cst_40 {dimension_numbers = #tpu.dot_dimension_numbers<[1], [0], [0], [1], [0, 0, 1, 1], [], []>} : vector<8x32xf32>, vector<32x128xf32>, vector<8x128xf32> -> vector<8x128xf32>
    %83 = vector.broadcast %80 : vector<1x128xf32> to vector<8x128xf32>
    %84 = arith.addf %82, %83 : vector<8x128xf32>
    %c0_41 = arith.constant 0 : index
    %c0_42 = arith.constant 0 : index
    %85 = vector.load %arg4[%c0_41, %c0_42] : memref<8x128xf32, #tpu.memory_space<vmem>>, vector<8x128xf32>
    tpu.vector_store %arg4[%c0_41, %c0_42], %84 {strides = array<i32>} : memref<8x128xf32, #tpu.memory_space<vmem>>, vector<8x128xf32>,
    return
  }
  func.func @transform_0(%arg0: i32) -> (i32, i32) {
    %c0_i32 = arith.constant 0 : i32
    %c0_i32_0 = arith.constant 0 : i32
    return %arg0, %c0_i32 : i32, i32
  }
  func.func @transform_1(%arg0: i32) -> (i32, i32) {
    %c0_i32 = arith.constant 0 : i32
    %c0_i32_0 = arith.constant 0 : i32
    %c0_i32_1 = arith.constant 0 : i32
    return %c0_i32, %c0_i32_0 : i32, i32
  }
  func.func @transform_2(%arg0: i32) -> (i32, i32) {
    %c0_i32 = arith.constant 0 : i32
    %c0_i32_0 = arith.constant 0 : i32
    %c0_i32_1 = arith.constant 0 : i32
    return %c0_i32, %c0_i32_0 : i32, i32
  }
  func.func @transform_3(%arg0: i32) -> (i32, i32) {
    %c0_i32 = arith.constant 0 : i32
    %c0_i32_0 = arith.constant 0 : i32
    return %arg0, %c0_i32 : i32, i32
  }
}

</mosaic_0001>

<bundles_post_ra>
// kernel: tpu_custom_call.1
= control target key start
LH: loop header
LB: loop body
LE: loop exit
PB: predicated region body
PF: predicated region fallthrough
CT: control target
= control target key end

     0   :  { %8 = vsyncpa [#allocation3], 0  ;;  %s1915_s0 = inlined_call_operand.hbm [shape: f32[8,128], index: 0, kind: input, shape index: {}]   ;;  %s1916_s1 = inlined_call_operand.hbm [shape: bf16[1024,256], index: 1, kind: input, shape index: {}]   ;;  %s1917_s2 = inlined_call_operand.hbm [shape: f32[16,256], index: 2, kind: input, shape index: {}]   ;;  %s1918_s3 = inlined_call_operand.hbm [shape: f32[8,128], index: 3, kind: output, shape index: {}]  }
   0x1   :  { %9 = vsyncpa [#allocation6], 0 }
   0x2   :  { %10 = vsyncpa [#allocation4], 0  ;;  %s1781_s12 = smov [#allocation5]   ;;  %s1687_s16 = scalar_lea.hbm %s1916_s1, 16384 }
   0x3   :  { %s26_s13 = sshll.u32 %s1781_s12, 4  ;;  %p1688_p0 = scmp.ne.s32.totalorder %s1916_s1, %s1687_s16  ;;  %s27_s13 = int_to_ptr.vmem [resolvable:$true] %s26_s13 }
   0x4   :  { %p1691_p1 = scmp.lt.u32.totalorder %s1687_s16, %s1916_s1 }
   0x6   :  { %p1693_p2 = pnand %p1691_p1, %p1688_p0 }
   0x8   :  { %1696 = shalt.err (!%p1693_p2)
}
   0x9   :  { %s1697_s21 = scalar_lea.vmem %s27_s13, 16384  ;;  %p1702_p4 = scmp.lt.s32.totalorder %s27_s13, %s27_s13 }
   0xa   :  { %p1698_p3 = scmp.ne.s32.totalorder %s27_s13, %s1697_s21  ;;  %p1703_p5 = scmp.lt.s32.totalorder %s1697_s21, %s1697_s21 }
   0xc   :  { %p1704_p6 = por %p1703_p5, %p1702_p4 }
   0xe   :  { %p1705_p7 = pnand %p1704_p6, %p1698_p3 }
  0x10   :  { %1708 = shalt.err (!%p1705_p7)
}
  0x11   :  { %s1782_s22 = smov 128   ;;  %s1783_s23 = smov 8  }
  0x12   :  { %32 = dma.hbm_to_vmem [thread:$0]  %s1916_s1, 16384, %s27_s13, [#allocation6], %s1782_s22, %s1782_s22, %s1783_s23  }
  0x13   :  { %s1784_s26 = smov [#allocation2]   ;;  %s1785_s28 = smov [#allocation7]  }
  0x14   :  { %s17_s27 = sshll.u32 %s1784_s26, 4  ;;  %s38_s29 = sshll.u32 %s1785_s28, 4  ;;  %s18_s27 = int_to_ptr.vmem [resolvable:$true] %s17_s27  ;;  %s39_s29 = int_to_ptr.vmem [resolvable:$true] %s38_s29 }
  0x15   :  { %s1709_s5 = scalar_lea.hbm %s1915_s0, 128 }
  0x16   :  { %p1710_p8 = scmp.ne.s32.totalorder %s1915_s0, %s1709_s5  ;;  %p1713_p9 = scmp.lt.u32.totalorder %s1709_s5, %s1915_s0 }
  0x18   :  { %p1715_p10 = pnand %p1713_p9, %p1710_p8 }
  0x1a   :  { %1718 = shalt.err (!%p1715_p10)
}
  0x1b   :  { %s1719_s1 = scalar_lea.vmem %s18_s27, 128  ;;  %p1724_p12 = scmp.lt.s32.totalorder %s18_s27, %s18_s27 }
  0x1c   :  { %p1720_p11 = scmp.ne.s32.totalorder %s18_s27, %s1719_s1  ;;  %p1725_p13 = scmp.lt.s32.totalorder %s1719_s1, %s1719_s1 }
  0x1e   :  { %p1726_p0 = por %p1725_p13, %p1724_p12 }
  0x20   :  { %p1727_p1 = pnand %p1726_p0, %p1720_p11 }
  0x22   :  { %1730 = shalt.err (!%p1727_p1)
}
  0x23   :  { %20 = dma.hbm_to_vmem [thread:$0]  %s1915_s0, 128, %s18_s27, [#allocation3]  }
  0x24   :  { %s1731_s14 = scalar_lea.hbm %s1917_s2, 512 }
  0x25   :  { %p1732_p2 = scmp.ne.s32.totalorder %s1917_s2, %s1731_s14  ;;  %p1735_p3 = scmp.lt.u32.totalorder %s1731_s14, %s1917_s2 }
  0x27   :  { %p1737_p4 = pnand %p1735_p3, %p1732_p2 }
  0x29   :  { %1740 = shalt.err (!%p1737_p4)
}
  0x2a   :  { %s1741_s19 = scalar_lea.vmem %s39_s29, 512  ;;  %p1746_p6 = scmp.lt.s32.totalorder %s39_s29, %s39_s29 }
  0x2b   :  { %p1742_p5 = scmp.ne.s32.totalorder %s39_s29, %s1741_s19  ;;  %p1747_p7 = scmp.lt.s32.totalorder %s1741_s19, %s1741_s19 }
  0x2d   :  { %p1748_p8 = por %p1747_p7, %p1746_p6 }
  0x2f   :  { %p1749_p9 = pnand %p1748_p8, %p1742_p5 }
  0x31   :  { %1752 = shalt.err (!%p1749_p9)
}
  0x32   :  { %s1786_s0 = smov 256   ;;  %s1787_s20 = smov 16  }
  0x33   :  { %44 = dma.hbm_to_vmem [thread:$0]  %s1917_s2, 512, %s39_s29, [#allocation6], %s1786_s0, %s1786_s0, %s1787_s20  }
  0x34   :  { %1775 = dma.done.wait [#allocation3], 128  }
  0x35   :  { %1776 = vsyncadd [#allocation3], 4294967168 }
  0x36   :  { %1777 = dma.done.wait [#allocation6], 16896  }
  0x37   :  { %1778 = vsyncadd [#allocation6], 4294950400  ;;  %v1788_v0 = vmov 0.0|0.0   ;;  %vm1789_vm0 = vmmov 0   ;;  %v1790_v1 = vmov 0.0   ;;  %v54_v3 = vld [vmem:[#allocation2] sm:$0xff] }
  0x38   :  { %1356 = vmatprep.subr.bf16.mxu1 %v1788_v0  ;;  %1246 = vmatprep.mubr.msk.f32.mxu1 %vm1789_vm0, %v1790_v1  ;;  %v1607_v2 = vld [vmem:[#allocation5] ss:$8 sps:$4 sm:$0xff]   ;;  %vm60_vm1 = vcmask 130048   ;;  %v1608_v4 = vld [vmem:[#allocation5 + $0x10] ss:$8 sps:$4 sm:$0xff]   ;;  %vm459_vm2 = vcmask 523264  }
  0x39   :  { %1362 = vmatprep.subr.bf16.mxu0 %v1788_v0  ;;  %1288 = vmatprep.mubr.msk.f32.mxu0 %vm1789_vm0, %v1790_v1  ;;  %v1609_v5 = vld [vmem:[#allocation5 + $0x20] ss:$8 sps:$4 sm:$0xff]   ;;  %v1610_v6 = vld [vmem:[#allocation5 + $0x30] ss:$8 sps:$4 sm:$0xff]   ;;  %v1625_v31 = vld [vmem:[#allocation5 + $0x124] ss:$8 sps:$4 sm:$0xff]  }
  0x3a   :  { %1358 = vmatpush3.bf16.msra.mxu1 %v1607_v2  ;;  %1364 = vmatpush3.bf16.msra.mxu0 %v1609_v5  ;;  %v1611_v7 = vld [vmem:[#allocation5 + $0x40] ss:$8 sps:$4 sm:$0xff]   ;;  %v1612_v8 = vld [vmem:[#allocation5 + $0x50] ss:$8 sps:$4 sm:$0xff]   ;;  %v1628_v33 = vld [vmem:[#allocation5 + $0x134] ss:$8 sps:$4 sm:$0xff]  }
  0x3b   :  { %1359 = vmatprep.subr.bf16.mxu1 %v1788_v0  ;;  %1365 = vmatprep.subr.bf16.mxu0 %v1788_v0  ;;  %v1613_v9 = vld [vmem:[#allocation5 + $0x60] ss:$8 sps:$4 sm:$0xff]   ;;  %v1614_v10 = vld [vmem:[#allocation5 + $0x70] ss:$8 sps:$4 sm:$0xff]   ;;  %v1631_v35 = vld [vmem:[#allocation5 + $0x144] ss:$8 sps:$4 sm:$0xff]  }
  0x3c   :  { %v1615_v11 = vld [vmem:[#allocation5 + $0x80] ss:$8 sps:$4 sm:$0xff]   ;;  %v1616_v17 = vld [vmem:[#allocation5 + $0x90] ss:$8 sps:$4 sm:$0xff]   ;;  %v1634_v42 = vld [vmem:[#allocation5 + $0x154] ss:$8 sps:$4 sm:$0xff]  }
  0x3d   :  { %1247 = vmatmul.mubr.msk.f32.vlgmr.msra.gmra.mrb[0].mxu1 %vm60_vm1, %v54_v3  ;;  %v59_v12 = vld [vmem:[#allocation7] ss:$0 sm:$0xff]  ;;  %v1618_v19 = vld [vmem:[#allocation5 + $0xb0] ss:$8 sps:$4 sm:$0xff]   ;;  %v139_v25 = vld [vmem:[#allocation7 + $0x1] ss:$0 sm:$0xff] }
  0x3e   :  { %1253 = vmatprep.mubr.msk.f32.mxu1 %vm1789_vm0, %v1790_v1  ;;  %1361 = vmatpush3.bf16.msra.mxu1 %v1608_v4  ;;  %v1617_v18 = vld [vmem:[#allocation5 + $0xa0] ss:$8 sps:$4 sm:$0xff]   ;;  %v1620_v21 = vld [vmem:[#allocation5 + $0xd0] ss:$8 sps:$4 sm:$0xff]   ;;  %v1653_v3 = vld [vmem:[#allocation5 + $0x264] ss:$8 sps:$4 sm:$0xff]  }
  0x3f   :  { %1386 = vmatprep.subr.bf16.mxu1 %v1788_v0  ;;  %1367 = vmatpush3.bf16.msra.mxu0 %v1610_v6  ;;  %v1619_v20 = vld [vmem:[#allocation5 + $0xc0] ss:$8 sps:$4 sm:$0xff]   ;;  %v1622_v23 = vld [vmem:[#allocation5 + $0xf0] ss:$8 sps:$4 sm:$0xff]   ;;  %v1656_v5 = vld [vmem:[#allocation5 + $0x274] ss:$8 sps:$4 sm:$0xff]  }
  0x40   :  { %1368 = vmatprep.subr.bf16.mxu0 %v1788_v0  ;;  %v1621_v22 = vld [vmem:[#allocation5 + $0xe0] ss:$8 sps:$4 sm:$0xff]   ;;  %v1624_v30 = vld [vmem:[#allocation5 + $0x110] ss:$8 sps:$4 sm:$0xff]   ;;  %vm1021_vm3 = vcmask 261120   ;;  %s1791_s2 = smov [#allocation8]  }
  0x41   :  { %v1623_v24 = vld [vmem:[#allocation5 + $0x100] ss:$8 sps:$4 sm:$0xff]   ;;  %v1630_v34 = vld [vmem:[#allocation5 + $0x130] ss:$8 sps:$4 sm:$0xff]   ;;  %s1102_s23 = sshll.u32 %s1791_s2, 4  ;;  %s1103_s23 = int_to_ptr.vmem [resolvable:$true] %s1102_s23 }
  0x42   :  { %v1627_v32 = vld [vmem:[#allocation5 + $0x120] ss:$8 sps:$4 sm:$0xff]   ;;  %v1636_v43 = vld [vmem:[#allocation5 + $0x150] ss:$8 sps:$4 sm:$0xff]   ;;  %s1753_s24 = scalar_lea.vmem %s1103_s23, 128  ;;  %p1758_p11 = scmp.lt.s32.totalorder %s1103_s23, %s1103_s23 }
  0x43   :  { %1370 = vmatpush3.bf16.msra.mxu0 %v1611_v7  ;;  %v1633_v36 = vld [vmem:[#allocation5 + $0x140] ss:$8 sps:$4 sm:$0xff]   ;;  %v1639_v46 = vld [vmem:[#allocation5 + $0x1f0] ss:$8 sps:$4 sm:$0xff]   ;;  %v449_v7 = vlaneseq  ;;  %p1754_p10 = scmp.ne.s32.totalorder %s1103_s23, %s1753_s24  ;;  %p1759_p12 = scmp.lt.s32.totalorder %s1753_s24, %s1753_s24 }
  0x44   :  { %1371 = vmatprep.subr.bf16.mxu0 %v1788_v0  ;;  %v246_v37 = vld [vmem:[#allocation7 + $0x2] ss:$0 sm:$0xff]  ;;  %v1640_v47 = vld [vmem:[#allocation5 + $0x170] ss:$8 sps:$4 sm:$0xff]   ;;  %v350_v57 = vld [vmem:[#allocation7 + $0x3] ss:$0 sm:$0xff] }
  0x45   :  { %v1637_v44 = vld [vmem:[#allocation5 + $0x1e0] ss:$8 sps:$4 sm:$0xff]   ;;  %v1643_v50 = vld [vmem:[#allocation5 + $0x210] ss:$8 sps:$4 sm:$0xff]   ;;  %p1760_p13 = por %p1759_p12, %p1758_p11 }
  0x46   :  { %v1638_v45 = vld [vmem:[#allocation5 + $0x160] ss:$8 sps:$4 sm:$0xff]   ;;  %v1644_v51 = vld [vmem:[#allocation5 + $0x190] ss:$8 sps:$4 sm:$0xff]  }
  0x47   :  { %1373 = vmatpush3.bf16.msra.mxu0 %v1612_v8  ;;  %v1641_v48 = vld [vmem:[#allocation5 + $0x200] ss:$8 sps:$4 sm:$0xff]   ;;  %v1647_v54 = vld [vmem:[#allocation5 + $0x230] ss:$8 sps:$4 sm:$0xff]   ;;  %v1880_v8 = vshrl.u32 %v449_v7, 7  ;;  %p1761_p0 = pnand %p1760_p13, %p1754_p10 }
  0x48   :  { %1374 = vmatprep.subr.bf16.mxu0 %v1788_v0  ;;  %v1642_v49 = vld [vmem:[#allocation5 + $0x180] ss:$8 sps:$4 sm:$0xff]   ;;  %v1648_v55 = vld [vmem:[#allocation5 + $0x1b0] ss:$8 sps:$4 sm:$0xff]  }
  0x49   :  { %v1645_v52 = vld [vmem:[#allocation5 + $0x220] ss:$8 sps:$4 sm:$0xff]   ;;  %v1651_v63 = vld [vmem:[#allocation5 + $0x250] ss:$8 sps:$4 sm:$0xff]  }
  0x4a   :  { %v1646_v53 = vld [vmem:[#allocation5 + $0x1a0] ss:$8 sps:$4 sm:$0xff]   ;;  %v1652_v2 = vld [vmem:[#allocation5 + $0x1d0] ss:$8 sps:$4 sm:$0xff]  }
  0x4b   :  { %1376 = vmatpush3.bf16.msra.mxu0 %v1613_v9  ;;  %v1649_v56 = vld [vmem:[#allocation5 + $0x240] ss:$8 sps:$4 sm:$0xff]   ;;  %v1658_v6 = vld [vmem:[#allocation5 + $0x270] ss:$8 sps:$4 sm:$0xff]   ;;  %v451_v9 = vsub.s32 0, %v1880_v8 }
  0x4c   :  { %1377 = vmatprep.subr.bf16.mxu0 %v1788_v0  ;;  %v1650_v62 = vld [vmem:[#allocation5 + $0x1c0] ss:$8 sps:$4 sm:$0xff]  }
  0x4d   :  { %v1655_v4 = vld [vmem:[#allocation5 + $0x260] ss:$8 sps:$4 sm:$0xff]  }
  0x4f   :  { %1379 = vmatpush3.bf16.msra.mxu0 %v1614_v10  ;;  %v447_v10 = vld [vmem:[#allocation7 + $0x4] ss:$8 sm:$0x3] }
  0x50   :  { %1380 = vmatprep.subr.bf16.mxu0 %v1788_v0 }
  0x53   :  { %1382 = vmatpush3.bf16.msra.mxu0 %v1615_v11  ;;  %v455_v11 = vsub.s32 1, %v1880_v8 }
  0x54   :  { %1383 = vmatprep.subr.bf16.mxu0 %v1788_v0 }
  0x57   :  { %1385 = vmatpush3.bf16.msra.mxu0 %v1616_v17 }
  0x58   :  { %1411 = vmatprep.subr.bf16.mxu0 %v1625_v31 }
 0x110   :  { %v130_v13 = vpop.f32.mrb[0].mxu1 }
 0x111   :  { %v131_v14 = vadd.f32 %v130_v13, %v59_v12  ;;  %v1248_v15 = vpop.f32.mrb[1].mxu1  ;;  %v452_v12 = vrot.slane %v447_v10, %v451_v9  ;;  %v456_v13 = vrot.slane %v447_v10, %v455_v11  ;;  %v1020_v10 = vld [vmem:[#allocation7 + $0x11] ss:$0 sm:$0xff] }
 0x113   :  { %v134_v16 = vmax.f32 %v131_v14, 0.0 }
 0x115   :  { %1254 = vmatmul.mubr.msk.f32.vlgmr.msra.gmra.mrb[2].mxu1 %vm60_vm1, %v134_v16 }
 0x116   :  { %1323 = vmatprep.mubr.msk.f32.mxu1 %vm1789_vm0, %v1790_v1  ;;  %1388 = vmatpush3.bf16.msra.mxu1 %v1617_v18 }
 0x117   :  { %1389 = vmatprep.subr.bf16.mxu1 %v1788_v0 }
 0x11a   :  { %1391 = vmatpush3.bf16.msra.mxu1 %v1618_v19 }
 0x11b   :  { %1392 = vmatprep.subr.bf16.mxu1 %v1788_v0 }
 0x11e   :  { %1394 = vmatpush3.bf16.msra.mxu1 %v1619_v20  ;;  %v1659_v20 = vld [vmem:[#allocation5 + $0x284] ss:$8 sps:$4 sm:$0xff]  }
 0x11f   :  { %1395 = vmatprep.subr.bf16.mxu1 %v1788_v0 }
 0x122   :  { %1397 = vmatpush3.bf16.msra.mxu1 %v1620_v21  ;;  %v1661_v21 = vld [vmem:[#allocation5 + $0x280] ss:$8 sps:$4 sm:$0xff]  }
 0x123   :  { %1398 = vmatprep.subr.bf16.mxu1 %v1788_v0 }
 0x126   :  { %1400 = vmatpush3.bf16.msra.mxu1 %v1621_v22  ;;  %v1662_v22 = vld [vmem:[#allocation5 + $0x294] ss:$8 sps:$4 sm:$0xff]  }
 0x127   :  { %1401 = vmatprep.subr.bf16.mxu1 %v1788_v0 }
 0x12a   :  { %1403 = vmatpush3.bf16.msra.mxu1 %v1622_v23  ;;  %v1664_v23 = vld [vmem:[#allocation5 + $0x290] ss:$8 sps:$4 sm:$0xff]  }
 0x12b   :  { %1404 = vmatprep.subr.bf16.mxu1 %v1788_v0 }
 0x12e   :  { %1406 = vmatpush3.bf16.msra.mxu1 %v1623_v24  ;;  %v1665_v24 = vld [vmem:[#allocation5 + $0x320] ss:$8 sps:$4 sm:$0xff]  }
 0x12f   :  { %1407 = vmatprep.subr.bf16.mxu1 %v1788_v0 }
 0x132   :  { %1409 = vmatpush3.bf16.msra.mxu1 %v1624_v30  ;;  %v1666_v30 = vld [vmem:[#allocation5 + $0x2a0] ss:$8 sps:$4 sm:$0xff]  }
 0x133   :  { %1427 = vmatprep.subr.bf16.mxu1 %v1637_v44  ;;  %v1679_v44 = vld [vmem:[#allocation5 + $0x390] ss:$8 sps:$4 sm:$0xff]  }
 0x1e8   :  { %v209_v26 = vpop.f32.mrb[2].mxu1 }
 0x1e9   :  { %v210_v27 = vadd.f32 %v209_v26, %v139_v25  ;;  %v1255_v28 = vpop.f32.mrb[3].mxu1  ;;  %v600_v26 = vld [vmem:[#allocation7 + $0x5] ss:$0 sm:$0xff] }
 0x1eb   :  { %v213_v29 = vmax.f32 %v210_v27, 0.0 }
 0x1ed   :  { %1289 = vmatmul.mubr.f32.vlgmr.msra.gmra.mrb[0].mxu0 %v213_v29 }
 0x1ee   :  { %527 = vmatprep.mubr.f32.mxu0 %v1790_v1  ;;  %1413 = vmatpush1.bf16.msra.mxu0 %v1627_v32  ;;  %v1667_v32 = vld [vmem:[#allocation5 + $0x330] ss:$8 sps:$4 sm:$0xff]  }
 0x1ef   :  { %1415 = vmatprep.subr.bf16.mxu0 %v1628_v33  ;;  %v1668_v33 = vld [vmem:[#allocation5 + $0x2b0] ss:$8 sps:$4 sm:$0xff]  }
 0x1f2   :  { %1417 = vmatpush1.bf16.msra.mxu0 %v1630_v34  ;;  %v1669_v34 = vld [vmem:[#allocation5 + $0x340] ss:$8 sps:$4 sm:$0xff]  }
 0x1f3   :  { %1419 = vmatprep.subr.bf16.mxu0 %v1631_v35  ;;  %v1670_v35 = vld [vmem:[#allocation5 + $0x2c0] ss:$8 sps:$4 sm:$0xff]  }
 0x1f6   :  { %1421 = vmatpush1.bf16.msra.mxu0 %v1633_v36  ;;  %v1671_v36 = vld [vmem:[#allocation5 + $0x350] ss:$8 sps:$4 sm:$0xff]  }
 0x1f7   :  { %1423 = vmatprep.subr.bf16.mxu0 %v1634_v42  ;;  %v1677_v42 = vld [vmem:[#allocation5 + $0x380] ss:$8 sps:$4 sm:$0xff]  }
 0x1fa   :  { %1425 = vmatpush1.bf16.msra.mxu0 %v1636_v43  ;;  %v1678_v43 = vld [vmem:[#allocation5 + $0x300] ss:$8 sps:$4 sm:$0xff]  }
 0x1fb   :  { %1459 = vmatprep.subr.bf16.mxu0 %v1653_v3 }
 0x2c0   :  { %v313_v38 = vpop.f32.mrb[0].mxu0 }
 0x2c1   :  { %v314_v39 = vadd.f32 %v313_v38, %v246_v37  ;;  %v1290_v40 = vpop.f32.mrb[1].mxu0  ;;  %v1672_v37 = vld [vmem:[#allocation5 + $0x2d0] ss:$8 sps:$4 sm:$0xff]   ;;  %v1673_v38 = vld [vmem:[#allocation5 + $0x360] ss:$8 sps:$4 sm:$0xff]  }
 0x2c2   :  { %v1675_v40 = vld [vmem:[#allocation5 + $0x370] ss:$8 sps:$4 sm:$0xff]  }
 0x2c3   :  { %v317_v41 = vmax.f32 %v314_v39, 0.0  ;;  %v1674_v39 = vld [vmem:[#allocation5 + $0x2e0] ss:$8 sps:$4 sm:$0xff]  }
 0x2c5   :  { %1324 = vmatmul.mubr.f32.vlgmr.msra.gmra.mrb[4].mxu1 %v317_v41  ;;  %v1676_v41 = vld [vmem:[#allocation5 + $0x2f0] ss:$8 sps:$4 sm:$0xff]  }
 0x2c6   :  { %1429 = vmatpush3.bf16.msra.mxu1 %v1638_v45  ;;  %v1680_v45 = vld [vmem:[#allocation5 + $0x310] ss:$8 sps:$4 sm:$0xff]  }
 0x2c7   :  { %1431 = vmatprep.subr.bf16.mxu1 %v1639_v46  ;;  %v1681_v46 = vld [vmem:[#allocation5 + $0x3a0] ss:$8 sps:$4 sm:$0xff]  }
 0x2ca   :  { %1433 = vmatpush3.bf16.msra.mxu1 %v1640_v47  ;;  %v1682_v47 = vld [vmem:[#allocation5 + $0x3b0] ss:$8 sps:$4 sm:$0xff]  }
 0x2cb   :  { %1435 = vmatprep.subr.bf16.mxu1 %v1641_v48  ;;  %v697_v48 = vld [vmem:[#allocation7 + $0x6] ss:$8 sm:$0x3] }
 0x2ce   :  { %1437 = vmatpush3.bf16.msra.mxu1 %v1642_v49  ;;  %v702_v49 = vrot.slane %v697_v48, %v451_v9 }
 0x2cf   :  { %1439 = vmatprep.subr.bf16.mxu1 %v1643_v50  ;;  %v706_v50 = vrot.slane %v697_v48, %v455_v11 }
 0x2d2   :  { %1441 = vmatpush3.bf16.msra.mxu1 %v1644_v51 }
 0x2d3   :  { %1443 = vmatprep.subr.bf16.mxu1 %v1645_v52 }
 0x2d6   :  { %1445 = vmatpush3.bf16.msra.mxu1 %v1646_v53 }
 0x2d7   :  { %1447 = vmatprep.subr.bf16.mxu1 %v1647_v54 }
 0x2da   :  { %1449 = vmatpush3.bf16.msra.mxu1 %v1648_v55 }
 0x2db   :  { %1451 = vmatprep.subr.bf16.mxu1 %v1649_v56 }
 0x2de   :  { %1453 = vmatpush3.bf16.msra.mxu1 %v1650_v62 }
 0x2df   :  { %1455 = vmatprep.subr.bf16.mxu1 %v1651_v63 }
 0x2e2   :  { %1457 = vmatpush3.bf16.msra.mxu1 %v1652_v2  ;;  %v1685_v2 = vld [vmem:[#allocation5 + $0x3e0] ss:$8 sps:$4 sm:$0xff]  }
 0x2e3   :  { %1506 = vmatprep.subr.bf16.mxu1 %v1788_v0 }
 0x398   :  { %v417_v58 = vpop.f32.mrb[4].mxu1 }
 0x399   :  { %v418_v59 = vadd.f32 %v417_v58, %v350_v57  ;;  %v1325_v60 = vpop.f32.mrb[5].mxu1  ;;  %v1683_v57 = vld [vmem:[#allocation5 + $0x3c0] ss:$8 sps:$4 sm:$0xff]   ;;  %v1684_v58 = vld [vmem:[#allocation5 + $0x3d0] ss:$8 sps:$4 sm:$0xff]  }
 0x39a   :  { %v849_v60 = vld [vmem:[#allocation7 + $0x7] ss:$0 sm:$0xff] }
 0x39b   :  { %v421_v61 = vmax.f32 %v418_v59, 0.0 }
 0x39d   :  { %1114 = vmatmul.mubr.msk.f32.vlgmr.msra.gmra.mrb[2].mxu0 %vm459_vm2, %v421_v61 }
 0x39e   :  { %776 = vmatprep.mubr.f32.mxu0 %v1790_v1  ;;  %1461 = vmatpush1.bf16.msra.mxu0 %v1655_v4  ;;  %v1686_v4 = vld [vmem:[#allocation5 + $0x3f0] ss:$8 sps:$4 sm:$0xff]  }
 0x39f   :  { %1463 = vmatprep.subr.bf16.mxu0 %v1656_v5  ;;  %v937_v5 = vld [vmem:[#allocation7 + $0x10] ss:$0 sm:$0xff] }
 0x3a2   :  { %1465 = vmatpush1.bf16.msra.mxu0 %v1658_v6 }
 0x3a3   :  { %1467 = vmatprep.subr.bf16.mxu0 %v1659_v20 }
 0x3a6   :  { %1469 = vmatpush1.bf16.msra.mxu0 %v1661_v21 }
 0x3a7   :  { %1471 = vmatprep.subr.bf16.mxu0 %v1662_v22 }
 0x3aa   :  { %1473 = vmatpush1.bf16.msra.mxu0 %v1664_v23 }
 0x3ab   :  { %1475 = vmatprep.subr.bf16.mxu0 %v1665_v24 }
 0x470   :  { %v529_v14 = vpop.f32.mrb[2].mxu0 }
 0x471   :  { %v530_v15 = vadd.f32 %v529_v14, %v452_v12  ;;  %v531_v16 = vpop.f32.mrb[3].mxu0 }
 0x472   :  { %v532_v17 = vadd.f32 %v531_v16, %v456_v13 }
 0x473   :  { %v534_v19 = vmax.f32 %v530_v15, 0.0 }
 0x474   :  { %v535_v18 = vmax.f32 %v532_v17, 0.0 }
 0x476   :  { %665 = vmatprep.mubr.f32.mxu1 %v535_v18 }
 0x477   :  { %666 = vmatmul.mubr.f32.vlgmr.msra.gmra.mrb[6].mxu1 %v534_v19 }
 0x478   :  { %1342 = vmatprep.mubr.msk.f32.mxu1 %vm1789_vm0, %v1790_v1  ;;  %1508 = vmatpush3.bf16.msra.mxu1 %v1681_v46 }
 0x479   :  { %1509 = vmatprep.subr.bf16.mxu1 %v1788_v0 }
 0x47c   :  { %1511 = vmatpush3.bf16.msra.mxu1 %v1682_v47 }
 0x47d   :  { %1512 = vmatprep.subr.bf16.mxu1 %v1788_v0 }
 0x480   :  { %1514 = vmatpush3.bf16.msra.mxu1 %v1683_v57 }
 0x481   :  { %1515 = vmatprep.subr.bf16.mxu1 %v1788_v0 }
 0x484   :  { %1517 = vmatpush3.bf16.msra.mxu1 %v1684_v58 }
 0x485   :  { %1518 = vmatprep.subr.bf16.mxu1 %v1788_v0 }
 0x54a   :  { %v1190_v25 = vpop.f32.mrb[6].mxu1 }
 0x54b   :  { %v1191_v27 = vpop.f32.mrb[7].mxu1 }
 0x54c   :  { %v1192_v28 = vadd.f32 %v1191_v27, %v1190_v25 }
 0x54e   :  { %v668_v29 = vadd.f32 %v1192_v28, %v600_v26 }
 0x550   :  { %v671_v31 = vmax.f32 %v668_v29, 0.0 }
 0x552   :  { %1115 = vmatmul.mubr.msk.f32.vlgmr.msra.gmra.mrb[4].mxu0 %vm459_vm2, %v671_v31 }
 0x553   :  { %1477 = vmatpush3.bf16.msra.mxu0 %v1666_v30 }
 0x554   :  { %1479 = vmatprep.subr.bf16.mxu0 %v1667_v32 }
 0x557   :  { %1481 = vmatpush3.bf16.msra.mxu0 %v1668_v33 }
 0x558   :  { %1483 = vmatprep.subr.bf16.mxu0 %v1669_v34 }
 0x55b   :  { %1485 = vmatpush3.bf16.msra.mxu0 %v1670_v35 }
 0x55c   :  { %1487 = vmatprep.subr.bf16.mxu0 %v1671_v36 }
 0x55f   :  { %1489 = vmatpush3.bf16.msra.mxu0 %v1672_v37 }
 0x560   :  { %1491 = vmatprep.subr.bf16.mxu0 %v1673_v38 }
 0x563   :  { %1493 = vmatpush3.bf16.msra.mxu0 %v1674_v39 }
 0x564   :  { %1495 = vmatprep.subr.bf16.mxu0 %v1675_v40 }
 0x567   :  { %1497 = vmatpush3.bf16.msra.mxu0 %v1676_v41 }
 0x568   :  { %1499 = vmatprep.subr.bf16.mxu0 %v1677_v42 }
 0x56b   :  { %1501 = vmatpush3.bf16.msra.mxu0 %v1678_v43 }
 0x56c   :  { %1503 = vmatprep.subr.bf16.mxu0 %v1679_v44 }
 0x56f   :  { %1505 = vmatpush3.bf16.msra.mxu0 %v1680_v45 }
 0x625   :  { %v778_v51 = vpop.f32.mrb[4].mxu0 }
 0x626   :  { %v779_v52 = vadd.f32 %v778_v51, %v702_v49  ;;  %v780_v53 = vpop.f32.mrb[5].mxu0 }
 0x627   :  { %v781_v54 = vadd.f32 %v780_v53, %v706_v50 }
 0x628   :  { %v783_v56 = vmax.f32 %v779_v52, 0.0 }
 0x629   :  { %v784_v55 = vmax.f32 %v781_v54, 0.0 }
 0x62b   :  { %914 = vmatprep.mubr.f32.mxu0 %v784_v55 }
 0x62c   :  { %915 = vmatmul.mubr.f32.vlgmr.msra.gmra.mrb[6].mxu0 %v783_v56 }
 0x6ff   :  { %v1225_v59 = vpop.f32.mrb[6].mxu0 }
 0x700   :  { %v1226_v61 = vpop.f32.mrb[7].mxu0 }
 0x701   :  { %v1227_v62 = vadd.f32 %v1226_v61, %v1225_v59 }
 0x703   :  { %v917_v63 = vadd.f32 %v1227_v62, %v849_v60 }
 0x705   :  { %v920_v3 = vmax.f32 %v917_v63, 0.0 }
 0x707   :  { %1343 = vmatmul.mubr.msk.f32.vlgmr.msra.gmra.mrb[8].mxu1 %vm459_vm2, %v920_v3 }
 0x708   :  { %1520 = vmatpush3.bf16.msra.mxu1 %v1685_v2  ;;  %1353 = vmatprep.mubr.msk.f32.mxu1 %vm1789_vm0, %v1790_v1 }
 0x709   :  { %1521 = vmatprep.subr.bf16.mxu1 %v1788_v0 }
 0x70c   :  { %1523 = vmatpush3.bf16.msra.mxu1 %v1686_v4 }
 0x7da   :  { %v1007_v6 = vpop.f32.mrb[8].mxu1 }
 0x7db   :  { %v1008_v7 = vadd.f32 %v1007_v6, %v937_v5  ;;  %v1344_v8 = vpop.f32.mrb[9].mxu1 }
 0x7dd   :  { %v1011_v9 = vmax.f32 %v1008_v7, 0.0 }
 0x7df   :  { %1354 = vmatmul.mubr.msk.f32.vlgmr.msra.gmra.mrb[10].mxu1 %vm1021_vm3, %v1011_v9 }
 0x8b2   :  { %v1091_v11 = vpop.f32.mrb[10].mxu1 }
 0x8b3   :  { %v1092_v12 = vadd.f32 %v1091_v11, %v1020_v10  ;;  %v1355_v13 = vpop.f32.mrb[11].mxu1 }
 0x8b5   :  { %1095 = vst [vmem:[#allocation8] sm:$0xff] %v1092_v12 }
 0x8b6   :  { %1764 = shalt.err (!%p1761_p0)
}
 0x8b7   :  { %s1765_s27 = scalar_lea.hbm %s1918_s3, 128 }
 0x8b8   :  { %p1766_p1 = scmp.ne.s32.totalorder %s1918_s3, %s1765_s27  ;;  %p1769_p2 = scmp.lt.u32.totalorder %s1765_s27, %s1918_s3 }
 0x8ba   :  { %p1771_p3 = pnand %p1769_p2, %p1766_p1 }
 0x8bc   :  { %1774 = shalt.err (!%p1771_p3)
}
 0x8bd   :  { %1105 = dma.vmem_to_hbm [thread:$0]  %s1103_s23, 128, %s1918_s3, [#allocation4]  }
 0x8be   :  { %1779 = dma.done.wait [#allocation4], 128  }
 0x8bf   :  { %1780 = vsyncadd [#allocation4], 4294967168 }
 0x8c0   :  { %1109 = vsyncpa [#allocation3], 1 }
 0x8c1   :  { %1110 = vsyncpa [#allocation6], 1 }
 0x8c2   :  { %1111 = vsyncpa [#allocation4], 1 }

</bundles_post_ra>
